<compile_context>
chip_gen: v7x
topology: tpu7x:2x2x1
jax: 0.10.0
libtpu: 0.0.40
codegen_flags: <defaults>
</compile_context>

<pallas_src>
import jax
import jax.numpy as jnp
from jax.experimental import pallas as pl
from jax.experimental.pallas import tpu as pltpu


# ---------------------------------------------------------------------------
# Fused Pallas kernel (single launch, whole problem resident in VMEM).
# ---------------------------------------------------------------------------
def gcn_fused_kernel(aug_ref, wfold_ref, adj_ref, b1_ref, w2_ref, b2_ref,
                     out_ref):
    # Stage 1: segmented embedding + gc1 weight, pre-folded into one matmul:
    #   s1 = segmented_embed(inp) @ W1 = aug @ (W_aug @ W1)
    s1 = jnp.dot(aug_ref[...], wfold_ref[...],
                 preferred_element_type=jnp.float32)             # [N, H] f32

    # Stage 2: h = relu(adj @ s1 + b1);  dropout = identity (eval mode).
    h = jnp.dot(adj_ref[...], s1.astype(jnp.bfloat16),
                preferred_element_type=jnp.float32)              # [N, H] f32
    h = jnp.maximum(h + b1_ref[...], 0.0)                        # f32 VPU path

    # t = h @ W2
    t = jnp.dot(h.astype(jnp.bfloat16), w2_ref[...],
                preferred_element_type=jnp.float32)              # [N, C] f32

    # Stage 3: out = adj @ t + b2
    o = jnp.dot(adj_ref[...], t.astype(jnp.bfloat16),
                preferred_element_type=jnp.float32)              # [N, C] f32
    out_ref[...] = o + b2_ref[...]


# ---------------------------------------------------------------------------
# Host-side helpers
# ---------------------------------------------------------------------------
def _round_up(x, m):
    return ((x + m - 1) // m) * m


def _pad2d(x, rows, cols):
    r, c = x.shape
    return jnp.pad(x, ((0, rows - r), (0, cols - c)))


def _build_aug_input(inp, mr, mu, mp):
    # [N, 3*(D+1)]: masked features + mask column (folds the per-segment bias).
    return jnp.concatenate([inp * mr, mr, inp * mu, mu, inp * mp, mp], axis=1)


def _build_aug_weight(wr, br, wu, bu, wp, bp):
    # [3*(D+1), nfeat]: stacked weights + biases, matching _build_aug_input.
    return jnp.concatenate([wr, br, wu, bu, wp, bp], axis=0)


# ---------------------------------------------------------------------------
# One-time preparation (hoisted out of the per-call path): pad + cast adj,
# pre-fold embed weights with W1, pad/cast gc weights and biases.
# ---------------------------------------------------------------------------
def gcn_prepare(params, adj, N):
    wr, br, wu, bu, wp, bp, g1w, g1b, g2w, g2b = params
    nhid = g1w.shape[1]
    nclass = g2w.shape[1]

    n_pad = _round_up(N, 128)             # 256 here: fills v6e/v7x 256-wide MXU
    h_pad = _round_up(nhid, 128)
    c_pad = _round_up(nclass, 128)        # lane-dense output stores
    k_aug = _round_up(3 * (wr.shape[0] + 1), 8)   # 27 -> 32

    # Sanity guard for the whole-in-VMEM fused design (see TODO above).
    assert n_pad * n_pad * 2 <= 8 * 1024 * 1024, (
        "adjacency too large for the fused single-VMEM kernel; "
        "use the row-striped / K-tiled variant")

    # Pre-fold W_fold = W_aug @ W1 in f32 (exact: no nonlinearity in between).
    wfold = _build_aug_weight(wr, br, wu, bu, wp, bp) @ g1w       # [27, nhid]
    wfold = _pad2d(wfold, k_aug, h_pad).astype(jnp.bfloat16)

    w2 = _pad2d(g2w, h_pad, c_pad).astype(jnp.bfloat16)
    b1 = _pad2d(g1b, 1, h_pad)                                    # f32
    b2 = _pad2d(g2b, 1, c_pad)                                    # f32

    adj_p = _pad2d(adj, n_pad, n_pad).astype(jnp.bfloat16)        # once per adj

    dims = (N, nclass, n_pad, k_aug, h_pad, c_pad)
    return (wfold, w2, b1, b2, adj_p), dims


# ---------------------------------------------------------------------------
# Forward using prepared operands: build the augmented input, single fused
# pallas_call, slice off padding.
# ---------------------------------------------------------------------------
def gcn_forward_prepared(inp_pad, mask_r, mask_u, mask_p, prepared, dims):
    wfold, w2, b1, b2, adj_p = prepared
    N, nclass, n_pad, k_aug, h_pad, c_pad = dims

    # Fused segmented-embedding operand (per-segment bias folded as mask col).
    aug = _build_aug_input(inp_pad, mask_r, mask_u, mask_p)       # [N, 27]
    aug = _pad2d(aug, n_pad, k_aug).astype(jnp.bfloat16)

    flops = 2 * (n_pad * k_aug * h_pad          # aug @ W_fold
                 + n_pad * n_pad * h_pad        # adj @ s1
                 + n_pad * h_pad * c_pad        # h @ W2
                 + n_pad * n_pad * c_pad)       # adj @ t
    bytes_accessed = (aug.size * 2 + wfold.size * 2 + adj_p.size * 2
                      + b1.size * 4 + w2.size * 2 + b2.size * 4
                      + n_pad * c_pad * 4)

    vmem_spec = pl.BlockSpec(memory_space=pltpu.MemorySpace.VMEM)

    out = pl.pallas_call(
        gcn_fused_kernel,
        out_shape=jax.ShapeDtypeStruct((n_pad, c_pad), jnp.float32),
        in_specs=[vmem_spec] * 6,
        out_specs=vmem_spec,
        compiler_params=pltpu.CompilerParams(
            vmem_limit_bytes=16 * 1024 * 1024),   # ~1 MiB needed; safe on v7x
        cost_estimate=pl.CostEstimate(
            flops=flops, transcendentals=0, bytes_accessed=bytes_accessed),
    )(aug, wfold, adj_p, b1, w2, b2)

    return out[:N, :nclass]


def gcn_forward(inp_pad, mask_r, mask_u, mask_p, params, adj):
    """Convenience one-shot wrapper (prepare + forward)."""
    prepared, dims = gcn_prepare(params, adj, inp_pad.shape[0])
    return gcn_forward_prepared(inp_pad, mask_r, mask_u, mask_p, prepared, dims)


# ---------------------------------------------------------------------------
# Plain-JAX references for verification.
# ---------------------------------------------------------------------------
def gcn_reference(inp_pad, mask_r, mask_u, mask_p, params, adj):
    """Original (f32) semantics of the PyTorch module (eval mode)."""
    wr, br, wu, bu, wp, bp, g1w, g1b, g2w, g2b = params
    xr = inp_pad @ wr + br
    xu = inp_pad @ wu + bu
    xp = inp_pad @ wp + bp
    x = mask_r * xr + mask_u * xu + mask_p * xp
    h1 = jnp.maximum(adj @ (x @ g1w) + g1b, 0.0)
    return adj @ (h1 @ g2w) + g2b


def gcn_reference_bf16(inp_pad, mask_r, mask_u, mask_p, params, adj):
    """Mimics the kernel's bf16-operand / f32-accumulate cast points
    (including the f32 pre-fold W_aug @ W1)."""
    wr, br, wu, bu, wp, bp, g1w, g1b, g2w, g2b = params
    bf, f32 = jnp.bfloat16, jnp.float32

    def dot(a, b):
        return jnp.dot(a.astype(bf), b.astype(bf), preferred_element_type=f32)

    aug = _build_aug_input(inp_pad, mask_r, mask_u, mask_p)
    wfold = _build_aug_weight(wr, br, wu, bu, wp, bp) @ g1w     # f32 pre-fold
    s1 = dot(aug, wfold)
    h = jnp.maximum(dot(adj, s1) + g1b, 0.0)
    t = dot(h, g2w)
    return dot(adj, t) + g2b


# ---------------------------------------------------------------------------
# Parameter / input construction (deterministic, synthetic).
# ---------------------------------------------------------------------------
def make_params(key, nfeat, nhid, nclass):
    ks = jax.random.split(key, 10)

    # linear_r: 5 -> nfeat, linear_u: 7 -> nfeat, linear_p: 6 -> nfeat.
    # Weights padded to 8 input rows; padded rows are zero so the padded input
    # columns never contribute (matches applying each linear only to the
    # "real" 5/6/7 features of its segment).
    def padded_linear(k, fan_in, fan_out):
        w = jax.random.normal(k, (fan_in, fan_out), jnp.float32) * 0.1
        return jnp.zeros((8, fan_out), jnp.float32).at[:fan_in].set(w)

    wr = padded_linear(ks[0], 5, nfeat)
    br = jax.random.normal(ks[1], (1, nfeat), jnp.float32) * 0.1
    wu = padded_linear(ks[2], 7, nfeat)
    bu = jax.random.normal(ks[3], (1, nfeat), jnp.float32) * 0.1
    wp = padded_linear(ks[4], 6, nfeat)
    bp = jax.random.normal(ks[5], (1, nfeat), jnp.float32) * 0.1
    g1w = jax.random.normal(ks[6], (nfeat, nhid), jnp.float32) * 0.1
    g1b = jax.random.normal(ks[7], (1, nhid), jnp.float32) * 0.1
    g2w = jax.random.normal(ks[8], (nhid, nclass), jnp.float32) * 0.1
    g2b = jax.random.normal(ks[9], (1, nclass), jnp.float32) * 0.1
    return (wr, br, wu, bu, wp, bp, g1w, g1b, g2w, g2b)


def make_segment_masks(N, nums):
    # Reproduces the slice assignments of GCN.forward:
    #   [0, n00) -> r, [n00, n01) -> u
    #   if n10 != n11: [n01, n10) -> r, [n10, n11) -> u
    #   if n20 != n21: [n11, n20) -> r, [n20, n21) -> u
    #   [n21, N)  -> p
    seg = [2] * N  # default p
    (n00, n01), (n10, n11), (n20, n21) = nums
    for i in range(0, n00):
        seg[i] = 0
    for i in range(n00, n01):
        seg[i] = 1
    if n10 != n11:
        for i in range(n01, n10):
            seg[i] = 0
        for i in range(n10, n11):
            seg[i] = 1
    if n20 != n21:
        for i in range(n11, n20):
            seg[i] = 0
        for i in range(n20, n21):
            seg[i] = 1
    for i in range(n21, N):
        seg[i] = 2
    seg = jnp.asarray(seg, jnp.int32)[:, None]           # [N, 1]
    mask_r = (seg == 0).astype(jnp.float32)
    mask_u = (seg == 1).astype(jnp.float32)
    mask_p = (seg == 2).astype(jnp.float32)
    return mask_r, mask_u, mask_p


if __name__ == "__main__":
    N, nfeat, nhid, nclass = 200, 32, 32, 8
    nums = [[30, 60], [90, 120], [150, 180]]

    key = jax.random.PRNGKey(0)
    k_params, k_inp, k_adj = jax.random.split(key, 3)

    params = make_params(k_params, nfeat, nhid, nclass)
    mask_r, mask_u, mask_p = make_segment_masks(N, nums)

    # Padded ragged input: r-rows use cols 0:5, u-rows 0:7, p-rows 0:6.
    # Extra columns can be anything; the zero-padded weight rows ignore them.
    inp_pad = jax.random.normal(k_inp, (N, 8), jnp.float32)

    # Row-normalized dense adjacency with self-loops (typical GCN input).
    a = (jax.random.uniform(k_adj, (N, N)) > 0.9).astype(jnp.float32)
    a = jnp.maximum(a, a.T) + jnp.eye(N, dtype=jnp.float32)
    adj = a / jnp.sum(a, axis=1, keepdims=True)

    # Prepare once (adj pad/cast, weight fold/pad) -> reuse across calls.
    prepared, dims = gcn_prepare(params, adj, N)
    out = gcn_forward_prepared(inp_pad, mask_r, mask_u, mask_p, prepared, dims)
    out = jax.block_until_ready(out)
    assert out.shape == (N, nclass)

    # Tight check against a reference that mimics the bf16 matmul-operand
    # casts, and a looser check against the exact f32 PyTorch semantics.
    ref_bf16 = gcn_reference_bf16(inp_pad, mask_r, mask_u, mask_p, params, adj)
    ref_f32 = gcn_reference(inp_pad, mask_r, mask_u, mask_p, params, adj)
    err_bf16 = float(jnp.max(jnp.abs(out - ref_bf16)))
    err_f32 = float(jnp.max(jnp.abs(out - ref_f32)))
    assert jnp.allclose(out, ref_bf16, atol=2e-3, rtol=2e-3), err_bf16
    assert jnp.allclose(out, ref_f32, atol=3e-2, rtol=3e-2), err_f32

    print("KERNEL_OK")
</pallas_src>

<mosaic_0001>
module attributes {stable_mosaic.version = 11 : i64} {
  func.func @gcn_fused_kernel(%arg0: memref<256x32xbf16, #tpu.memory_space<vmem>>, %arg1: memref<32x128xbf16, #tpu.memory_space<vmem>>, %arg2: memref<256x256xbf16, #tpu.memory_space<vmem>>, %arg3: memref<1x128xf32, #tpu.memory_space<vmem>>, %arg4: memref<128x128xbf16, #tpu.memory_space<vmem>>, %arg5: memref<1x128xf32, #tpu.memory_space<vmem>>, %arg6: memref<256x128xf32, #tpu.memory_space<vmem>>) attributes {dimension_semantics = [], scalar_prefetch = 0 : i64, scratch_operands = 0 : i64, tpu.core_type = #tpu.core_type<tc>} {
    %c0 = arith.constant 0 : index
    %c0_0 = arith.constant 0 : index
    %0 = vector.load %arg0[%c0, %c0_0] : memref<256x32xbf16, #tpu.memory_space<vmem>>, vector<256x32xbf16>
    %c0_1 = arith.constant 0 : index
    %c0_2 = arith.constant 0 : index
    %1 = vector.load %arg1[%c0_1, %c0_2] : memref<32x128xbf16, #tpu.memory_space<vmem>>, vector<32x128xbf16>
    %cst = arith.constant dense<0.000000e+00> : vector<256x128xf32>
    %2 = tpu.matmul %0, %1, %cst {dimension_numbers = #tpu.dot_dimension_numbers<[1], [0], [0], [1], [0, 0, 1, 1], [], []>} : vector<256x32xbf16>, vector<32x128xbf16>, vector<256x128xf32> -> vector<256x128xf32>
    %c0_3 = arith.constant 0 : index
    %c0_4 = arith.constant 0 : index
    %3 = vector.load %arg2[%c0_3, %c0_4] : memref<256x256xbf16, #tpu.memory_space<vmem>>, vector<256x256xbf16>
    %4 = arith.truncf %2 : vector<256x128xf32> to vector<256x128xbf16>
    %cst_5 = arith.constant dense<0.000000e+00> : vector<256x128xf32>
    %5 = tpu.matmul %3, %4, %cst_5 {dimension_numbers = #tpu.dot_dimension_numbers<[1], [0], [0], [1], [0, 0, 1, 1], [], []>} : vector<256x256xbf16>, vector<256x128xbf16>, vector<256x128xf32> -> vector<256x128xf32>
    %c0_6 = arith.constant 0 : index
    %c0_7 = arith.constant 0 : index
    %6 = vector.load %arg3[%c0_6, %c0_7] : memref<1x128xf32, #tpu.memory_space<vmem>>, vector<1x128xf32>
    %7 = vector.broadcast %6 : vector<1x128xf32> to vector<256x128xf32>
    %8 = arith.addf %5, %7 : vector<256x128xf32>
    %cst_8 = arith.constant 0.000000e+00 : f32
    %9 = vector.broadcast %cst_8 : f32 to vector<256x128xf32>
    %10 = arith.maximumf %8, %9 : vector<256x128xf32>
    %11 = arith.truncf %10 : vector<256x128xf32> to vector<256x128xbf16>
    %c0_9 = arith.constant 0 : index
    %c0_10 = arith.constant 0 : index
    %12 = vector.load %arg4[%c0_9, %c0_10] : memref<128x128xbf16, #tpu.memory_space<vmem>>, vector<128x128xbf16>
    %cst_11 = arith.constant dense<0.000000e+00> : vector<256x128xf32>
    %13 = tpu.matmul %11, %12, %cst_11 {dimension_numbers = #tpu.dot_dimension_numbers<[1], [0], [0], [1], [0, 0, 1, 1], [], []>} : vector<256x128xbf16>, vector<128x128xbf16>, vector<256x128xf32> -> vector<256x128xf32>
    %c0_12 = arith.constant 0 : index
    %c0_13 = arith.constant 0 : index
    %14 = vector.load %arg2[%c0_12, %c0_13] : memref<256x256xbf16, #tpu.memory_space<vmem>>, vector<256x256xbf16>
    %15 = arith.truncf %13 : vector<256x128xf32> to vector<256x128xbf16>
    %cst_14 = arith.constant dense<0.000000e+00> : vector<256x128xf32>
    %16 = tpu.matmul %14, %15, %cst_14 {dimension_numbers = #tpu.dot_dimension_numbers<[1], [0], [0], [1], [0, 0, 1, 1], [], []>} : vector<256x256xbf16>, vector<256x128xbf16>, vector<256x128xf32> -> vector<256x128xf32>
    %c0_15 = arith.constant 0 : index
    %c0_16 = arith.constant 0 : index
    %17 = vector.load %arg5[%c0_15, %c0_16] : memref<1x128xf32, #tpu.memory_space<vmem>>, vector<1x128xf32>
    %18 = vector.broadcast %17 : vector<1x128xf32> to vector<256x128xf32>
    %19 = arith.addf %16, %18 : vector<256x128xf32>
    %c0_17 = arith.constant 0 : index
    %c0_18 = arith.constant 0 : index
    %20 = vector.load %arg6[%c0_17, %c0_18] : memref<256x128xf32, #tpu.memory_space<vmem>>, vector<256x128xf32>
    tpu.vector_store %arg6[%c0_17, %c0_18], %19 {strides = array<i32>} : memref<256x128xf32, #tpu.memory_space<vmem>>, vector<256x128xf32>,
    return
  }
}

</mosaic_0001>

<bundles_post_ra>
// kernel: tpu_custom_call.1
= control target key start
LH: loop header
LB: loop body
LE: loop exit
PB: predicated region body
PF: predicated region fallthrough
CT: control target
= control target key end

     0   :  { %11 = vsyncpa [#allocation3], 0  ;;  %s2188_s0 = inlined_call_operand.vmem [shape: bf16[256,32], index: 0, kind: input, shape index: {}]   ;;  %s2189_s1 = inlined_call_operand.vmem [shape: bf16[32,128], index: 1, kind: input, shape index: {}]   ;;  %s2190_s2 = inlined_call_operand.hbm [shape: bf16[256,256], index: 2, kind: input, shape index: {}]   ;;  %s2191_s3 = inlined_call_operand.vmem [shape: f32[1,128], index: 3, kind: input, shape index: {}]   ;;  %s2192_s4 = inlined_call_operand.vmem [shape: bf16[128,128], index: 4, kind: input, shape index: {}]   ;;  %s2193_s5 = inlined_call_operand.vmem [shape: f32[1,128], index: 5, kind: input, shape index: {}]   ;;  %s2194_s6 = inlined_call_operand.hbm [shape: f32[256,128], index: 6, kind: output, shape index: {}]  }
   0x1   :  { %12 = vsyncpa [#allocation4], 0  ;;  %s1827_s21 = smov [#allocation2]   ;;  %s1779_s25 = scalar_lea.hbm %s2190_s2, 4096 }
   0x2   :  { %s22_s22 = sshll.u32 %s1827_s21, 4  ;;  %p1780_p0 = scmp.ne.s32.totalorder %s2190_s2, %s1779_s25  ;;  %s23_s22 = int_to_ptr.vmem [resolvable:$true] %s22_s22 }
   0x3   :  { %p1783_p1 = scmp.lt.u32.totalorder %s1779_s25, %s2190_s2 }
   0x5   :  { %p1785_p2 = pnand %p1783_p1, %p1780_p0 }
   0x7   :  { %1788 = shalt.err (!%p1785_p2)
}
   0x8   :  { %s1789_s30 = scalar_lea.vmem %s23_s22, 4096  ;;  %p1794_p4 = scmp.lt.s32.totalorder %s23_s22, %s23_s22 }
   0x9   :  { %p1790_p3 = scmp.ne.s32.totalorder %s23_s22, %s1789_s30  ;;  %p1795_p5 = scmp.lt.s32.totalorder %s1789_s30, %s1789_s30 }
   0xb   :  { %p1796_p6 = por %p1795_p5, %p1794_p4 }
   0xd   :  { %p1797_p7 = pnand %p1796_p6, %p1790_p3 }
   0xf   :  { %1800 = shalt.err (!%p1797_p7)
}
  0x10   :  { %s1828_s7 = smov 128   ;;  %s1829_s8 = smov 8  }
  0x11   :  { %28 = dma.hbm_to_vmem [thread:$0]  %s2190_s2, 4096, %s23_s22, [#allocation3], %s1828_s7, %s1828_s7, %s1829_s8  }
  0x12   :  { %1823 = dma.done.wait [#allocation3], 4096  }
  0x13   :  { %1824 = vsyncadd [#allocation3], 4294963200  ;;  %v1705_v0 = vld [vmem:[%s2189_s1] sm:$0xff]   ;;  %v1706_v1 = vld [vmem:[%s2189_s1 + $0x8] sm:$0xff]   ;;  %vm167_vm0 = vcmask 261120  }
  0x14   :  { %1601 = vmatprep.subr.bf16.mxu0 %v1705_v0  ;;  %v1707_v2 = vld [vmem:[%s2188_s0] sm:$0xff]   ;;  %v1708_v3 = vld [vmem:[%s2188_s0 + $0x8] sm:$0xff]   ;;  %v1709_v4 = vld [vmem:[%s2188_s0 + $0x10] sm:$0xff]  }
  0x15   :  { %1602 = vmatpush3.bf16.msra.mxu0 %v1705_v0  ;;  %1605 = vmatprep.mubr.msk.bf16.mxu0 %vm167_vm0, %v1707_v2  ;;  %v1710_v5 = vld [vmem:[%s2188_s0 + $0x18] sm:$0xff]   ;;  %v1711_v6 = vld [vmem:[%s2188_s0 + $0x20] sm:$0xff]   ;;  %v1712_v7 = vld [vmem:[%s2188_s0 + $0x28] sm:$0xff]  }
  0x16   :  { %1603 = vmatprep.subr.bf16.mxu0 %v1706_v1  ;;  %v1713_v8 = vld [vmem:[%s2188_s0 + $0x30] sm:$0xff]   ;;  %v1714_v9 = vld [vmem:[%s2188_s0 + $0x38] sm:$0xff]   ;;  %v1715_v10 = vld [vmem:[%s2188_s0 + $0x40] sm:$0xff]  }
  0x17   :  { %v1716_v11 = vld [vmem:[%s2188_s0 + $0x48] sm:$0xff]   ;;  %v1717_v12 = vld [vmem:[%s2188_s0 + $0x50] sm:$0xff]   ;;  %v1718_v13 = vld [vmem:[%s2188_s0 + $0x58] sm:$0xff]  }
  0x18   :  { %v1719_v14 = vld [vmem:[%s2188_s0 + $0x60] sm:$0xff]   ;;  %v1720_v15 = vld [vmem:[%s2188_s0 + $0x68] sm:$0xff]   ;;  %v1721_v16 = vld [vmem:[%s2188_s0 + $0x70] sm:$0xff]  }
  0x19   :  { %1604 = vmatpush3.bf16.msra.mxu0 %v1706_v1  ;;  %v1722_v17 = vld [vmem:[%s2188_s0 + $0x78] sm:$0xff]   ;;  %v1951_v18 = vld [vmem:[#allocation2 + $0x4] ss:$8 sps:$4 sm:$0xff]  }
  0x1a   :  { %624 = vmatprep.mubr.bf16.mxu1 %v1951_v18 }
  0x1c   :  { %1606 = vmatmul.mubr.msk.bf16.vlgmr.msra.gmra.mrb[0].mxu0 %vm167_vm0, %v1708_v3  ;;  %v1771_v3 = vld [vmem:[%s2192_s4] sm:$0xff]  }
  0x1d   :  { %1609 = vmatprep.mubr.msk.bf16.mxu0 %vm167_vm0, %v1709_v4  ;;  %v1772_v4 = vld [vmem:[%s2192_s4 + $0x8] sm:$0xff]   ;;  %1637 = vmatprep.subr.bf16.mxu0 %v1771_v3 }
  0x1e   :  { %1638 = vmatpush3.bf16.msra.mxu0 %v1771_v3 }
  0x1f   :  { %1639 = vmatprep.subr.bf16.mxu0 %v1772_v4 }
  0x22   :  { %1640 = vmatpush3.bf16.msra.mxu0 %v1772_v4 }
  0x24   :  { %1610 = vmatmul.mubr.msk.bf16.gmra.mrb[4].mxu0 %vm167_vm0, %v1710_v5  ;;  %v1960_v5 = vld [vmem:[#allocation2] ss:$8 sps:$4 sm:$0xff]  }
  0x25   :  { %1613 = vmatprep.mubr.msk.bf16.mxu0 %vm167_vm0, %v1711_v6  ;;  %v1773_v6 = vld [vmem:[%s2192_s4 + $0x10] sm:$0xff]  }
  0x26   :  { %1641 = vmatprep.subr.bf16.mxu0 %v1773_v6 }
  0x27   :  { %1642 = vmatpush3.bf16.msra.mxu0 %v1773_v6 }
  0x2c   :  { %1614 = vmatmul.mubr.msk.bf16.gmra.mrb[8].mxu0 %vm167_vm0, %v1712_v7  ;;  %v1965_v7 = vld [vmem:[#allocation2 + $0x14] ss:$8 sps:$4 sm:$0xff]  }
  0x2d   :  { %1617 = vmatprep.mubr.msk.bf16.mxu0 %vm167_vm0, %v1713_v8  ;;  %v1969_v8 = vld [vmem:[#allocation2 + $0x10] ss:$8 sps:$4 sm:$0xff]  }
  0x34   :  { %1618 = vmatmul.mubr.msk.bf16.gmra.mrb[12].mxu0 %vm167_vm0, %v1714_v9  ;;  %v1971_v9 = vld [vmem:[#allocation2 + $0x24] ss:$8 sps:$4 sm:$0xff]  }
  0x35   :  { %1621 = vmatprep.mubr.msk.bf16.mxu0 %vm167_vm0, %v1715_v10  ;;  %v1975_v10 = vld [vmem:[#allocation2 + $0x20] ss:$8 sps:$4 sm:$0xff]  }
  0x3c   :  { %1622 = vmatmul.mubr.msk.bf16.gmra.mrb[16].mxu0 %vm167_vm0, %v1716_v11  ;;  %v1977_v11 = vld [vmem:[#allocation2 + $0x34] ss:$8 sps:$4 sm:$0xff]  }
  0x3d   :  { %1625 = vmatprep.mubr.msk.bf16.mxu0 %vm167_vm0, %v1717_v12  ;;  %v1981_v12 = vld [vmem:[#allocation2 + $0x30] ss:$8 sps:$4 sm:$0xff]  }
  0x44   :  { %1626 = vmatmul.mubr.msk.bf16.gmra.mrb[20].mxu0 %vm167_vm0, %v1718_v13  ;;  %v1983_v13 = vld [vmem:[#allocation2 + $0x44] ss:$8 sps:$4 sm:$0xff]  }
  0x45   :  { %1629 = vmatprep.mubr.msk.bf16.mxu0 %vm167_vm0, %v1719_v14  ;;  %v1987_v14 = vld [vmem:[#allocation2 + $0x40] ss:$8 sps:$4 sm:$0xff]  }
  0x4c   :  { %1630 = vmatmul.mubr.msk.bf16.gmra.mrb[24].mxu0 %vm167_vm0, %v1720_v15  ;;  %v1989_v15 = vld [vmem:[#allocation2 + $0x54] ss:$8 sps:$4 sm:$0xff]  }
  0x4d   :  { %1633 = vmatprep.mubr.msk.bf16.mxu0 %vm167_vm0, %v1721_v16  ;;  %v1993_v16 = vld [vmem:[#allocation2 + $0x50] ss:$8 sps:$4 sm:$0xff]  }
  0x54   :  { %1634 = vmatmul.mubr.msk.bf16.gmra.mrb[28].mxu0 %vm167_vm0, %v1722_v17  ;;  %v1995_v17 = vld [vmem:[#allocation2 + $0x64] ss:$8 sps:$4 sm:$0xff]  }
  0xef   :  { %v1607_v19 = vpop.f32.mrb[0].mxu0 }
  0xf0   :  { %v250_v20 = vpop.f32.mrb[1].mxu0 }
  0xf1   :  { %v1608_v21 = vpop.f32.mrb[2].mxu0 }
  0xf2   :  { %v410_v22 = vpack.c.bf16 %v1608_v21, %v1607_v19  ;;  %v253_v23 = vpop.f32.mrb[3].mxu0  ;;  %v1999_v19 = vld [vmem:[#allocation2 + $0x60] ss:$8 sps:$4 sm:$0xff]   ;;  %v2005_v21 = vld [vmem:[#allocation2 + $0x70] ss:$8 sps:$4 sm:$0xff]  }
  0xf3   :  { %v409_v24 = vpack.c.bf16 %v253_v23, %v250_v20  ;;  %v2001_v20 = vld [vmem:[#allocation2 + $0x74] ss:$8 sps:$4 sm:$0xff]   ;;  %v2011_v23 = vld [vmem:[#allocation2 + $0x80] ss:$8 sps:$4 sm:$0xff]  }
  0xf7   :  { %v1611_v25 = vpop.f32.mrb[4].mxu0 }
  0xf8   :  { %v266_v26 = vpop.f32.mrb[5].mxu0 }
  0xf9   :  { %v1612_v27 = vpop.f32.mrb[6].mxu0 }
  0xfa   :  { %v412_v28 = vpack.c.bf16 %v1612_v27, %v1611_v25  ;;  %v269_v29 = vpop.f32.mrb[7].mxu0  ;;  %v2017_v25 = vld [vmem:[#allocation2 + $0x90] ss:$8 sps:$4 sm:$0xff]   ;;  %v2020_v27 = vld [vmem:[#allocation2 + $0xa0] ss:$8 sps:$4 sm:$0xff]  }
  0xfb   :  { %v411_v30 = vpack.c.bf16 %v269_v29, %v266_v26  ;;  %v1753_v26 = vld [vmem:[#allocation2 + $0xa4] ss:$8 sps:$4 sm:$0xff]   ;;  %v1774_v29 = vld [vmem:[%s2192_s4 + $0x18] sm:$0xff]  }
  0xfc   :  { %1643 = vmatprep.subr.bf16.mxu0 %v1774_v29 }
  0xfd   :  { %1644 = vmatpush3.bf16.msra.mxu0 %v1774_v29 }
  0xff   :  { %v1615_v31 = vpop.f32.mrb[8].mxu0 }
 0x100   :  { %v282_v32 = vpop.f32.mrb[9].mxu0 }
 0x101   :  { %v1616_v33 = vpop.f32.mrb[10].mxu0 }
 0x102   :  { %v414_v34 = vpack.c.bf16 %v1616_v33, %v1615_v31  ;;  %v285_v35 = vpop.f32.mrb[11].mxu0  ;;  %v2031_v31 = vld [vmem:[#allocation2 + $0xc4] ss:$8 sps:$4 sm:$0xff]  }
 0x103   :  { %v413_v36 = vpack.c.bf16 %v285_v35, %v282_v32  ;;  %v1775_v32 = vld [vmem:[%s2192_s4 + $0x20] sm:$0xff]   ;;  %v1776_v33 = vld [vmem:[%s2192_s4 + $0x28] sm:$0xff]   ;;  %v2043_v35 = vld [vmem:[#allocation2 + $0xd4] ss:$8 sps:$4 sm:$0xff]  }
 0x104   :  { %1645 = vmatprep.subr.bf16.mxu0 %v1775_v32 }
 0x105   :  { %1646 = vmatpush3.bf16.msra.mxu0 %v1775_v32 }
 0x106   :  { %1647 = vmatprep.subr.bf16.mxu0 %v1776_v33 }
 0x107   :  { %v1619_v37 = vpop.f32.mrb[12].mxu0 }
 0x108   :  { %v298_v38 = vpop.f32.mrb[13].mxu0 }
 0x109   :  { %v1620_v39 = vpop.f32.mrb[14].mxu0  ;;  %1648 = vmatpush3.bf16.msra.mxu0 %v1776_v33 }
 0x10a   :  { %v416_v40 = vpack.c.bf16 %v1620_v39, %v1619_v37  ;;  %v301_v41 = vpop.f32.mrb[15].mxu0  ;;  %v1778_v37 = vld [vmem:[%s2192_s4 + $0x38] sm:$0xff]   ;;  %v2055_v39 = vld [vmem:[#allocation2 + $0xe4] ss:$8 sps:$4 sm:$0xff]  }
 0x10b   :  { %v415_v42 = vpack.c.bf16 %v301_v41, %v298_v38  ;;  %v2053_v38 = vld [vmem:[#allocation2 + $0xd0] ss:$8 sps:$4 sm:$0xff]   ;;  %v2061_v41 = vld [vmem:[#allocation2 + $0xf4] ss:$8 sps:$4 sm:$0xff]  }
 0x10f   :  { %v1623_v43 = vpop.f32.mrb[16].mxu0 }
 0x110   :  { %v314_v44 = vpop.f32.mrb[17].mxu0 }
 0x111   :  { %v1624_v45 = vpop.f32.mrb[18].mxu0 }
 0x112   :  { %v418_v46 = vpack.c.bf16 %v1624_v45, %v1623_v43  ;;  %v317_v47 = vpop.f32.mrb[19].mxu0 }
 0x113   :  { %v417_v48 = vpack.c.bf16 %v317_v47, %v314_v44  ;;  %v2071_v44 = vld [vmem:[%s2191_s3] ss:$0 sm:$0xff] }
 0x115   :  { %1353 = vmatprep.subr.bf16.mxu1 %v417_v48 }
 0x116   :  { %1354 = vmatpush3.bf16.msra.mxu1 %v409_v24  ;;  %v2013_v24 = vld [vmem:[#allocation2 + $0x94] ss:$8 sps:$4 sm:$0xff]  }
 0x117   :  { %v1627_v49 = vpop.f32.mrb[20].mxu0  ;;  %1355 = vmatprep.subr.bf16.mxu1 %v418_v46 }
 0x118   :  { %v330_v50 = vpop.f32.mrb[21].mxu0 }
 0x119   :  { %v1628_v51 = vpop.f32.mrb[22].mxu0 }
 0x11a   :  { %v420_v52 = vpack.c.bf16 %v1628_v51, %v1627_v49  ;;  %v333_v53 = vpop.f32.mrb[23].mxu0  ;;  %1356 = vmatpush3.bf16.msra.mxu1 %v410_v22  ;;  %v2007_v22 = vld [vmem:[#allocation2 + $0x84] ss:$8 sps:$4 sm:$0xff]  }
 0x11b   :  { %v419_v54 = vpack.c.bf16 %v333_v53, %v330_v50 }
 0x11d   :  { %1357 = vmatprep.subr.bf16.mxu1 %v419_v54 }
 0x11e   :  { %1358 = vmatpush3.bf16.msra.mxu1 %v411_v30  ;;  %v2029_v30 = vld [vmem:[#allocation2 + $0xb0] ss:$8 sps:$4 sm:$0xff]  }
 0x11f   :  { %v1631_v55 = vpop.f32.mrb[24].mxu0  ;;  %1359 = vmatprep.subr.bf16.mxu1 %v420_v52 }
 0x120   :  { %v346_v56 = vpop.f32.mrb[25].mxu0 }
 0x121   :  { %v1632_v57 = vpop.f32.mrb[26].mxu0 }
 0x122   :  { %v422_v58 = vpack.c.bf16 %v1632_v57, %v1631_v55  ;;  %v349_v59 = vpop.f32.mrb[27].mxu0  ;;  %1360 = vmatpush3.bf16.msra.mxu1 %v412_v28  ;;  %v2022_v28 = vld [vmem:[#allocation2 + $0xb4] ss:$8 sps:$4 sm:$0xff]  }
 0x123   :  { %v421_v60 = vpack.c.bf16 %v349_v59, %v346_v56 }
 0x125   :  { %1361 = vmatprep.subr.bf16.mxu1 %v421_v60 }
 0x126   :  { %1362 = vmatpush3.bf16.msra.mxu1 %v413_v36  ;;  %v1777_v36 = vld [vmem:[%s2192_s4 + $0x30] sm:$0xff]  }
 0x127   :  { %v1635_v61 = vpop.f32.mrb[28].mxu0  ;;  %1363 = vmatprep.subr.bf16.mxu1 %v422_v58  ;;  %1649 = vmatprep.subr.bf16.mxu0 %v1777_v36 }
 0x128   :  { %v362_v62 = vpop.f32.mrb[29].mxu0  ;;  %1650 = vmatpush3.bf16.msra.mxu0 %v1777_v36 }
 0x129   :  { %v1636_v63 = vpop.f32.mrb[30].mxu0  ;;  %1651 = vmatprep.subr.bf16.mxu0 %v1778_v37 }
 0x12a   :  { %v424_v0 = vpack.c.bf16 %v1636_v63, %v1635_v61  ;;  %v365_v1 = vpop.f32.mrb[31].mxu0  ;;  %1364 = vmatpush3.bf16.msra.mxu1 %v414_v34  ;;  %v2041_v34 = vld [vmem:[#allocation2 + $0xc0] ss:$8 sps:$4 sm:$0xff]  }
 0x12b   :  { %v423_v2 = vpack.c.bf16 %v365_v1, %v362_v62 }
 0x12c   :  { %1652 = vmatpush3.bf16.msra.mxu0 %v1778_v37 }
 0x12d   :  { %1365 = vmatprep.subr.bf16.mxu1 %v423_v2 }
 0x12e   :  { %1366 = vmatpush3.bf16.msra.mxu1 %v415_v42  ;;  %v2065_v42 = vld [vmem:[#allocation2 + $0xf0] ss:$8 sps:$4 sm:$0xff]  }
 0x12f   :  { %1367 = vmatprep.subr.bf16.mxu1 %v424_v0 }
 0x132   :  { %1368 = vmatpush3.bf16.msra.mxu1 %v416_v40  ;;  %v2059_v40 = vld [vmem:[#allocation2 + $0xe0] ss:$8 sps:$4 sm:$0xff]  }
 0x135   :  { %625 = vmatmul.mubr.bf16.vlgmr.msra.gmra.mrb[0].mxu1 %v1960_v5 }
 0x136   :  { %632 = vmatprep.mubr.bf16.mxu1 %v1965_v7 }
 0x13d   :  { %633 = vmatmul.mubr.bf16.gmra.mrb[4].mxu1 %v1969_v8 }
 0x13e   :  { %640 = vmatprep.mubr.bf16.mxu1 %v1971_v9 }
 0x145   :  { %641 = vmatmul.mubr.bf16.gmra.mrb[8].mxu1 %v1975_v10 }
 0x146   :  { %648 = vmatprep.mubr.bf16.mxu1 %v1977_v11 }
 0x14d   :  { %649 = vmatmul.mubr.bf16.gmra.mrb[12].mxu1 %v1981_v12 }
 0x14e   :  { %656 = vmatprep.mubr.bf16.mxu1 %v1983_v13 }
 0x155   :  { %657 = vmatmul.mubr.bf16.gmra.mrb[16].mxu1 %v1987_v14 }
 0x156   :  { %664 = vmatprep.mubr.bf16.mxu1 %v1989_v15 }
 0x15d   :  { %665 = vmatmul.mubr.bf16.gmra.mrb[20].mxu1 %v1993_v16 }
 0x15e   :  { %672 = vmatprep.mubr.bf16.mxu1 %v1995_v17 }
 0x165   :  { %673 = vmatmul.mubr.bf16.gmra.mrb[24].mxu1 %v1999_v19 }
 0x166   :  { %680 = vmatprep.mubr.bf16.mxu1 %v2001_v20 }
 0x16d   :  { %681 = vmatmul.mubr.bf16.gmra.mrb[28].mxu1 %v2005_v21 }
 0x16e   :  { %688 = vmatprep.mubr.bf16.mxu1 %v2007_v22 }
 0x175   :  { %689 = vmatmul.mubr.bf16.gmra.mrb[32].mxu1 %v2011_v23 }
 0x176   :  { %696 = vmatprep.mubr.bf16.mxu1 %v2013_v24 }
 0x17d   :  { %697 = vmatmul.mubr.bf16.gmra.mrb[36].mxu1 %v2017_v25 }
 0x17e   :  { %704 = vmatprep.mubr.bf16.mxu1 %v1753_v26 }
 0x185   :  { %705 = vmatmul.mubr.bf16.gmra.mrb[40].mxu1 %v2020_v27 }
 0x186   :  { %712 = vmatprep.mubr.bf16.mxu1 %v2022_v28 }
 0x18d   :  { %713 = vmatmul.mubr.bf16.gmra.mrb[44].mxu1 %v2029_v30 }
 0x18e   :  { %720 = vmatprep.mubr.bf16.mxu1 %v2031_v31 }
 0x195   :  { %721 = vmatmul.mubr.bf16.gmra.mrb[48].mxu1 %v2041_v34 }
 0x196   :  { %728 = vmatprep.mubr.bf16.mxu1 %v2043_v35 }
 0x19d   :  { %729 = vmatmul.mubr.bf16.gmra.mrb[52].mxu1 %v2053_v38 }
 0x19e   :  { %736 = vmatprep.mubr.bf16.mxu1 %v2055_v39 }
 0x1a5   :  { %737 = vmatmul.mubr.bf16.gmra.mrb[56].mxu1 %v2059_v40 }
 0x1a6   :  { %744 = vmatprep.mubr.bf16.mxu1 %v2061_v41 }
 0x1ad   :  { %745 = vmatmul.mubr.bf16.gmra.mrb[60].mxu1 %v2065_v42 }
 0x1ae   :  { %1161 = vmatprep.mubr.bf16.mxu1 %v1753_v26 }
 0x208   :  { %v1369_v43 = vpop.f32.mrb[0].mxu1 }
 0x209   :  { %v1370_v45 = vpop.f32.mrb[1].mxu1 }
 0x20a   :  { %v1371_v46 = vadd.f32 %v1370_v45, %v1369_v43  ;;  %v1372_v47 = vpop.f32.mrb[2].mxu1 }
 0x20b   :  { %v1373_v48 = vpop.f32.mrb[3].mxu1 }
 0x20c   :  { %v627_v49 = vadd.f32 %v1371_v46, %v2071_v44  ;;  %v1374_v50 = vadd.f32 %v1373_v48, %v1372_v47 }
 0x20e   :  { %v630_v51 = vadd.f32 %v1374_v50, %v2071_v44  ;;  %v753_v52 = vmax.f32 %v627_v49, 0.0 }
 0x210   :  { %v754_v53 = vmax.f32 %v630_v51, 0.0  ;;  %v1375_v54 = vpop.f32.mrb[4].mxu1 }
 0x211   :  { %v1376_v55 = vpop.f32.mrb[5].mxu1 }
 0x212   :  { %v1377_v56 = vadd.f32 %v1376_v55, %v1375_v54  ;;  %v1378_v57 = vpop.f32.mrb[6].mxu1  ;;  %v785_v58 = vpack.c.bf16 %v754_v53, %v753_v52 }
 0x213   :  { %v1379_v59 = vpop.f32.mrb[7].mxu1 }
 0x214   :  { %v635_v60 = vadd.f32 %v1377_v56, %v2071_v44  ;;  %v1380_v61 = vadd.f32 %v1379_v59, %v1378_v57  ;;  %1653 = vmatprep.mubr.bf16.mxu0 %v785_v58 }
 0x216   :  { %v638_v62 = vadd.f32 %v1380_v61, %v2071_v44  ;;  %v755_v63 = vmax.f32 %v635_v60, 0.0 }
 0x218   :  { %v756_v0 = vmax.f32 %v638_v62, 0.0  ;;  %v1381_v1 = vpop.f32.mrb[8].mxu1 }
 0x219   :  { %v1382_v2 = vpop.f32.mrb[9].mxu1 }
 0x21a   :  { %v786_v3 = vpack.c.bf16 %v756_v0, %v755_v63  ;;  %v1383_v4 = vadd.f32 %v1382_v2, %v1381_v1  ;;  %v1384_v6 = vpop.f32.mrb[10].mxu1 }
 0x21b   :  { %v1385_v26 = vpop.f32.mrb[11].mxu1 }
 0x21c   :  { %v643_v29 = vadd.f32 %v1383_v4, %v2071_v44  ;;  %v1386_v32 = vadd.f32 %v1385_v26, %v1384_v6  ;;  %1654 = vmatmul.mubr.bf16.vlgmr.msra.gmra.mrb[32].mxu0 %v786_v3 }
 0x21e   :  { %v646_v33 = vadd.f32 %v1386_v32, %v2071_v44  ;;  %v757_v36 = vmax.f32 %v643_v29, 0.0 }
 0x220   :  { %v758_v37 = vmax.f32 %v646_v33, 0.0  ;;  %v1387_v43 = vpop.f32.mrb[12].mxu1 }
 0x221   :  { %v1388_v45 = vpop.f32.mrb[13].mxu1 }
 0x222   :  { %v1389_v46 = vadd.f32 %v1388_v45, %v1387_v43  ;;  %v1390_v47 = vpop.f32.mrb[14].mxu1  ;;  %v787_v48 = vpack.c.bf16 %v758_v37, %v757_v36 }
 0x223   :  { %v1391_v49 = vpop.f32.mrb[15].mxu1 }
 0x224   :  { %v651_v50 = vadd.f32 %v1389_v46, %v2071_v44  ;;  %v1392_v51 = vadd.f32 %v1391_v49, %v1390_v47  ;;  %1657 = vmatprep.mubr.bf16.mxu0 %v787_v48 }
 0x226   :  { %v654_v52 = vadd.f32 %v1392_v51, %v2071_v44  ;;  %v759_v53 = vmax.f32 %v651_v50, 0.0 }
 0x228   :  { %v760_v54 = vmax.f32 %v654_v52, 0.0  ;;  %v1393_v55 = vpop.f32.mrb[16].mxu1 }
 0x229   :  { %v1394_v56 = vpop.f32.mrb[17].mxu1 }
 0x22a   :  { %v1395_v57 = vadd.f32 %v1394_v56, %v1393_v55  ;;  %v1396_v58 = vpop.f32.mrb[18].mxu1  ;;  %v788_v59 = vpack.c.bf16 %v760_v54, %v759_v53 }
 0x22b   :  { %v1397_v60 = vpop.f32.mrb[19].mxu1 }
 0x22c   :  { %v659_v61 = vadd.f32 %v1395_v57, %v2071_v44  ;;  %v1398_v62 = vadd.f32 %v1397_v60, %v1396_v58  ;;  %1658 = vmatmul.mubr.bf16.gmra.mrb[36].mxu0 %v788_v59 }
 0x22e   :  { %v662_v63 = vadd.f32 %v1398_v62, %v2071_v44  ;;  %v761_v0 = vmax.f32 %v659_v61, 0.0 }
 0x230   :  { %v762_v1 = vmax.f32 %v662_v63, 0.0  ;;  %v1399_v2 = vpop.f32.mrb[20].mxu1 }
 0x231   :  { %v1400_v3 = vpop.f32.mrb[21].mxu1 }
 0x232   :  { %v1401_v4 = vadd.f32 %v1400_v3, %v1399_v2  ;;  %v1402_v6 = vpop.f32.mrb[22].mxu1  ;;  %v789_v26 = vpack.c.bf16 %v762_v1, %v761_v0 }
 0x233   :  { %v1403_v29 = vpop.f32.mrb[23].mxu1 }
 0x234   :  { %v667_v32 = vadd.f32 %v1401_v4, %v2071_v44  ;;  %v1404_v33 = vadd.f32 %v1403_v29, %v1402_v6  ;;  %1661 = vmatprep.mubr.bf16.mxu0 %v789_v26 }
 0x236   :  { %v670_v36 = vadd.f32 %v1404_v33, %v2071_v44  ;;  %v763_v37 = vmax.f32 %v667_v32, 0.0 }
 0x238   :  { %v764_v43 = vmax.f32 %v670_v36, 0.0  ;;  %v1405_v45 = vpop.f32.mrb[24].mxu1 }
 0x239   :  { %v1406_v46 = vpop.f32.mrb[25].mxu1 }
 0x23a   :  { %v1407_v47 = vadd.f32 %v1406_v46, %v1405_v45  ;;  %v1408_v48 = vpop.f32.mrb[26].mxu1  ;;  %v790_v49 = vpack.c.bf16 %v764_v43, %v763_v37 }
 0x23b   :  { %v1409_v50 = vpop.f32.mrb[27].mxu1 }
 0x23c   :  { %v675_v51 = vadd.f32 %v1407_v47, %v2071_v44  ;;  %v1410_v52 = vadd.f32 %v1409_v50, %v1408_v48  ;;  %1662 = vmatmul.mubr.bf16.gmra.mrb[40].mxu0 %v790_v49 }
 0x23e   :  { %v678_v53 = vadd.f32 %v1410_v52, %v2071_v44  ;;  %v765_v54 = vmax.f32 %v675_v51, 0.0 }
 0x240   :  { %v766_v55 = vmax.f32 %v678_v53, 0.0  ;;  %v1411_v56 = vpop.f32.mrb[28].mxu1 }
 0x241   :  { %v1412_v57 = vpop.f32.mrb[29].mxu1 }
 0x242   :  { %v1413_v58 = vadd.f32 %v1412_v57, %v1411_v56  ;;  %v1414_v59 = vpop.f32.mrb[30].mxu1  ;;  %v791_v60 = vpack.c.bf16 %v766_v55, %v765_v54 }
 0x243   :  { %v1415_v61 = vpop.f32.mrb[31].mxu1 }
 0x244   :  { %v683_v62 = vadd.f32 %v1413_v58, %v2071_v44  ;;  %v1416_v63 = vadd.f32 %v1415_v61, %v1414_v59  ;;  %1665 = vmatprep.mubr.bf16.mxu0 %v791_v60 }
 0x246   :  { %v686_v0 = vadd.f32 %v1416_v63, %v2071_v44  ;;  %v767_v1 = vmax.f32 %v683_v62, 0.0 }
 0x248   :  { %v768_v2 = vmax.f32 %v686_v0, 0.0  ;;  %v1417_v3 = vpop.f32.mrb[32].mxu1 }
 0x249   :  { %v1418_v4 = vpop.f32.mrb[33].mxu1 }
 0x24a   :  { %v1419_v6 = vadd.f32 %v1418_v4, %v1417_v3  ;;  %v1420_v26 = vpop.f32.mrb[34].mxu1  ;;  %v792_v29 = vpack.c.bf16 %v768_v2, %v767_v1 }
 0x24b   :  { %v1421_v32 = vpop.f32.mrb[35].mxu1 }
 0x24c   :  { %v691_v33 = vadd.f32 %v1419_v6, %v2071_v44  ;;  %v1422_v36 = vadd.f32 %v1421_v32, %v1420_v26  ;;  %1666 = vmatmul.mubr.bf16.gmra.mrb[44].mxu0 %v792_v29 }
 0x24e   :  { %v694_v37 = vadd.f32 %v1422_v36, %v2071_v44  ;;  %v769_v43 = vmax.f32 %v691_v33, 0.0 }
 0x250   :  { %v770_v45 = vmax.f32 %v694_v37, 0.0  ;;  %v1423_v46 = vpop.f32.mrb[36].mxu1 }
 0x251   :  { %v1424_v47 = vpop.f32.mrb[37].mxu1 }
 0x252   :  { %v1425_v48 = vadd.f32 %v1424_v47, %v1423_v46  ;;  %v1426_v49 = vpop.f32.mrb[38].mxu1  ;;  %v793_v50 = vpack.c.bf16 %v770_v45, %v769_v43 }
 0x253   :  { %v1427_v51 = vpop.f32.mrb[39].mxu1 }
 0x254   :  { %v699_v52 = vadd.f32 %v1425_v48, %v2071_v44  ;;  %v1428_v53 = vadd.f32 %v1427_v51, %v1426_v49  ;;  %1669 = vmatprep.mubr.bf16.mxu0 %v793_v50 }
 0x256   :  { %v702_v54 = vadd.f32 %v1428_v53, %v2071_v44  ;;  %v771_v55 = vmax.f32 %v699_v52, 0.0 }
 0x258   :  { %v772_v56 = vmax.f32 %v702_v54, 0.0  ;;  %v1429_v57 = vpop.f32.mrb[40].mxu1 }
 0x259   :  { %v1430_v58 = vpop.f32.mrb[41].mxu1 }
 0x25a   :  { %v794_v59 = vpack.c.bf16 %v772_v56, %v771_v55  ;;  %v1431_v60 = vadd.f32 %v1430_v58, %v1429_v57  ;;  %v1432_v61 = vpop.f32.mrb[42].mxu1 }
 0x25b   :  { %v1433_v62 = vpop.f32.mrb[43].mxu1 }
 0x25c   :  { %1670 = vmatmul.mubr.bf16.gmra.mrb[48].mxu0 %v794_v59  ;;  %v707_v63 = vadd.f32 %v1431_v60, %v2071_v44  ;;  %v1434_v0 = vadd.f32 %v1433_v62, %v1432_v61 }
 0x25e   :  { %v710_v1 = vadd.f32 %v1434_v0, %v2071_v44  ;;  %v773_v2 = vmax.f32 %v707_v63, 0.0 }
 0x260   :  { %v774_v3 = vmax.f32 %v710_v1, 0.0  ;;  %v1435_v4 = vpop.f32.mrb[44].mxu1 }
 0x261   :  { %v1436_v6 = vpop.f32.mrb[45].mxu1 }
 0x262   :  { %v1437_v26 = vadd.f32 %v1436_v6, %v1435_v4  ;;  %v1438_v29 = vpop.f32.mrb[46].mxu1  ;;  %v795_v32 = vpack.c.bf16 %v774_v3, %v773_v2 }
 0x263   :  { %v1439_v33 = vpop.f32.mrb[47].mxu1 }
 0x264   :  { %v715_v36 = vadd.f32 %v1437_v26, %v2071_v44  ;;  %v1440_v37 = vadd.f32 %v1439_v33, %v1438_v29  ;;  %1673 = vmatprep.mubr.bf16.mxu0 %v795_v32 }
 0x266   :  { %v718_v43 = vadd.f32 %v1440_v37, %v2071_v44  ;;  %v775_v45 = vmax.f32 %v715_v36, 0.0 }
 0x268   :  { %v776_v46 = vmax.f32 %v718_v43, 0.0  ;;  %v1441_v47 = vpop.f32.mrb[48].mxu1 }
 0x269   :  { %v1442_v48 = vpop.f32.mrb[49].mxu1 }
 0x26a   :  { %v796_v49 = vpack.c.bf16 %v776_v46, %v775_v45  ;;  %v1443_v50 = vadd.f32 %v1442_v48, %v1441_v47  ;;  %v1444_v51 = vpop.f32.mrb[50].mxu1 }
 0x26b   :  { %v1445_v52 = vpop.f32.mrb[51].mxu1 }
 0x26c   :  { %1674 = vmatmul.mubr.bf16.gmra.mrb[52].mxu0 %v796_v49  ;;  %v723_v53 = vadd.f32 %v1443_v50, %v2071_v44  ;;  %v1446_v54 = vadd.f32 %v1445_v52, %v1444_v51 }
 0x26e   :  { %v726_v55 = vadd.f32 %v1446_v54, %v2071_v44  ;;  %v777_v56 = vmax.f32 %v723_v53, 0.0 }
 0x270   :  { %v778_v57 = vmax.f32 %v726_v55, 0.0  ;;  %v1447_v58 = vpop.f32.mrb[52].mxu1 }
 0x271   :  { %v1448_v59 = vpop.f32.mrb[53].mxu1 }
 0x272   :  { %v1449_v60 = vadd.f32 %v1448_v59, %v1447_v58  ;;  %v1450_v61 = vpop.f32.mrb[54].mxu1  ;;  %v797_v62 = vpack.c.bf16 %v778_v57, %v777_v56 }
 0x273   :  { %v1451_v63 = vpop.f32.mrb[55].mxu1 }
 0x274   :  { %v731_v0 = vadd.f32 %v1449_v60, %v2071_v44  ;;  %v1452_v1 = vadd.f32 %v1451_v63, %v1450_v61  ;;  %1677 = vmatprep.mubr.bf16.mxu0 %v797_v62 }
 0x276   :  { %v734_v2 = vadd.f32 %v1452_v1, %v2071_v44  ;;  %v779_v3 = vmax.f32 %v731_v0, 0.0 }
 0x278   :  { %v780_v4 = vmax.f32 %v734_v2, 0.0  ;;  %v1453_v6 = vpop.f32.mrb[56].mxu1 }
 0x279   :  { %v1454_v26 = vpop.f32.mrb[57].mxu1 }
 0x27a   :  { %v798_v29 = vpack.c.bf16 %v780_v4, %v779_v3  ;;  %v1455_v32 = vadd.f32 %v1454_v26, %v1453_v6  ;;  %v1456_v33 = vpop.f32.mrb[58].mxu1 }
 0x27b   :  { %v1457_v36 = vpop.f32.mrb[59].mxu1 }
 0x27c   :  { %1678 = vmatmul.mubr.bf16.gmra.mrb[56].mxu0 %v798_v29  ;;  %v739_v37 = vadd.f32 %v1455_v32, %v2071_v44  ;;  %v1458_v43 = vadd.f32 %v1457_v36, %v1456_v33 }
 0x27e   :  { %v742_v45 = vadd.f32 %v1458_v43, %v2071_v44  ;;  %v781_v46 = vmax.f32 %v739_v37, 0.0 }
 0x280   :  { %v782_v47 = vmax.f32 %v742_v45, 0.0  ;;  %v1459_v48 = vpop.f32.mrb[60].mxu1 }
 0x281   :  { %v1460_v49 = vpop.f32.mrb[61].mxu1 }
 0x282   :  { %v1461_v50 = vadd.f32 %v1460_v49, %v1459_v48  ;;  %v1462_v51 = vpop.f32.mrb[62].mxu1  ;;  %v799_v52 = vpack.c.bf16 %v782_v47, %v781_v46 }
 0x283   :  { %v1463_v53 = vpop.f32.mrb[63].mxu1 }
 0x284   :  { %v747_v54 = vadd.f32 %v1461_v50, %v2071_v44  ;;  %v1464_v55 = vadd.f32 %v1463_v53, %v1462_v51  ;;  %1681 = vmatprep.mubr.bf16.mxu0 %v799_v52 }
 0x286   :  { %v750_v56 = vadd.f32 %v1464_v55, %v2071_v44  ;;  %v783_v57 = vmax.f32 %v747_v54, 0.0 }
 0x288   :  { %v784_v58 = vmax.f32 %v750_v56, 0.0 }
 0x28a   :  { %v800_v59 = vpack.c.bf16 %v784_v58, %v783_v57 }
 0x28c   :  { %1682 = vmatmul.mubr.bf16.gmra.mrb[60].mxu0 %v800_v59 }
 0x28d   :  { %1081 = vmatprep.mubr.bf16.mxu0 %v1951_v18 }
 0x2ef   :  { %v1655_v60 = vpop.f32.mrb[32].mxu0 }
 0x2f0   :  { %v899_v61 = vpop.f32.mrb[33].mxu0 }
 0x2f1   :  { %v1656_v62 = vpop.f32.mrb[34].mxu0 }
 0x2f2   :  { %v1027_v63 = vpack.c.bf16 %v1656_v62, %v1655_v60  ;;  %v902_v0 = vpop.f32.mrb[35].mxu0 }
 0x2f3   :  { %v1026_v1 = vpack.c.bf16 %v902_v0, %v899_v61 }
 0x2ff   :  { %v1659_v2 = vpop.f32.mrb[36].mxu0 }
 0x300   :  { %v915_v3 = vpop.f32.mrb[37].mxu0 }
 0x301   :  { %v1660_v4 = vpop.f32.mrb[38].mxu0 }
 0x302   :  { %v1029_v6 = vpack.c.bf16 %v1660_v4, %v1659_v2  ;;  %v918_v26 = vpop.f32.mrb[39].mxu0 }
 0x303   :  { %v1028_v29 = vpack.c.bf16 %v918_v26, %v915_v3 }
 0x30f   :  { %v1663_v32 = vpop.f32.mrb[40].mxu0 }
 0x310   :  { %v931_v44 = vpop.f32.mrb[41].mxu0 }
 0x311   :  { %v1664_v33 = vpop.f32.mrb[42].mxu0 }
 0x312   :  { %v1031_v36 = vpack.c.bf16 %v1664_v33, %v1663_v32  ;;  %v934_v37 = vpop.f32.mrb[43].mxu0 }
 0x313   :  { %v1030_v43 = vpack.c.bf16 %v934_v37, %v931_v44 }
 0x31f   :  { %v1667_v45 = vpop.f32.mrb[44].mxu0 }
 0x320   :  { %v947_v18 = vpop.f32.mrb[45].mxu0 }
 0x321   :  { %v1668_v46 = vpop.f32.mrb[46].mxu0 }
 0x322   :  { %v1033_v47 = vpack.c.bf16 %v1668_v46, %v1667_v45  ;;  %v950_v48 = vpop.f32.mrb[47].mxu0 }
 0x323   :  { %v1032_v49 = vpack.c.bf16 %v950_v48, %v947_v18 }
 0x32f   :  { %v1671_v50 = vpop.f32.mrb[48].mxu0 }
 0x330   :  { %v963_v51 = vpop.f32.mrb[49].mxu0 }
 0x331   :  { %v1672_v52 = vpop.f32.mrb[50].mxu0 }
 0x332   :  { %v1035_v53 = vpack.c.bf16 %v1672_v52, %v1671_v50  ;;  %v966_v54 = vpop.f32.mrb[51].mxu0 }
 0x333   :  { %v1034_v55 = vpack.c.bf16 %v966_v54, %v963_v51 }
 0x335   :  { %1489 = vmatprep.subr.bf16.mxu0 %v1034_v55  ;;  %1685 = vmatprep.subr.bf16.mxu1 %v1034_v55 }
 0x336   :  { %1490 = vmatpush3.bf16.msra.mxu0 %v1026_v1  ;;  %1693 = vmatpush3.bf16.msra.mxu1 %v1026_v1 }
 0x337   :  { %1491 = vmatprep.subr.bf16.mxu0 %v1035_v53  ;;  %1686 = vmatprep.subr.bf16.mxu1 %v1035_v53 }
 0x33a   :  { %1492 = vmatpush3.bf16.msra.mxu0 %v1027_v63  ;;  %1694 = vmatpush3.bf16.msra.mxu1 %v1027_v63 }
 0x33f   :  { %v1675_v56 = vpop.f32.mrb[52].mxu0 }
 0x340   :  { %v979_v57 = vpop.f32.mrb[53].mxu0 }
 0x341   :  { %v1676_v58 = vpop.f32.mrb[54].mxu0 }
 0x342   :  { %v1037_v59 = vpack.c.bf16 %v1676_v58, %v1675_v56  ;;  %v982_v60 = vpop.f32.mrb[55].mxu0 }
 0x343   :  { %v1036_v61 = vpack.c.bf16 %v982_v60, %v979_v57 }
 0x345   :  { %1493 = vmatprep.subr.bf16.mxu0 %v1036_v61  ;;  %1687 = vmatprep.subr.bf16.mxu1 %v1036_v61 }
 0x346   :  { %1494 = vmatpush3.bf16.msra.mxu0 %v1028_v29  ;;  %1695 = vmatpush3.bf16.msra.mxu1 %v1028_v29 }
 0x347   :  { %1495 = vmatprep.subr.bf16.mxu0 %v1037_v59  ;;  %1688 = vmatprep.subr.bf16.mxu1 %v1037_v59 }
 0x34a   :  { %1496 = vmatpush3.bf16.msra.mxu0 %v1029_v6  ;;  %1696 = vmatpush3.bf16.msra.mxu1 %v1029_v6 }
 0x34f   :  { %v1679_v62 = vpop.f32.mrb[56].mxu0 }
 0x350   :  { %v995_v0 = vpop.f32.mrb[57].mxu0 }
 0x351   :  { %v1680_v1 = vpop.f32.mrb[58].mxu0 }
 0x352   :  { %v1039_v2 = vpack.c.bf16 %v1680_v1, %v1679_v62  ;;  %v998_v3 = vpop.f32.mrb[59].mxu0 }
 0x353   :  { %v1038_v63 = vpack.c.bf16 %v998_v3, %v995_v0 }
 0x355   :  { %1497 = vmatprep.subr.bf16.mxu0 %v1038_v63  ;;  %1689 = vmatprep.subr.bf16.mxu1 %v1038_v63 }
 0x356   :  { %1498 = vmatpush3.bf16.msra.mxu0 %v1030_v43  ;;  %1697 = vmatpush3.bf16.msra.mxu1 %v1030_v43 }
 0x357   :  { %1499 = vmatprep.subr.bf16.mxu0 %v1039_v2  ;;  %1690 = vmatprep.subr.bf16.mxu1 %v1039_v2 }
 0x35a   :  { %1500 = vmatpush3.bf16.msra.mxu0 %v1031_v36  ;;  %1698 = vmatpush3.bf16.msra.mxu1 %v1031_v36 }
 0x35f   :  { %v1683_v4 = vpop.f32.mrb[60].mxu0 }
 0x360   :  { %v1011_v26 = vpop.f32.mrb[61].mxu0 }
 0x361   :  { %v1684_v29 = vpop.f32.mrb[62].mxu0 }
 0x362   :  { %v1041_v32 = vpack.c.bf16 %v1684_v29, %v1683_v4  ;;  %v1014_v44 = vpop.f32.mrb[63].mxu0 }
 0x363   :  { %v1040_v6 = vpack.c.bf16 %v1014_v44, %v1011_v26 }
 0x365   :  { %1501 = vmatprep.subr.bf16.mxu0 %v1040_v6  ;;  %1691 = vmatprep.subr.bf16.mxu1 %v1040_v6 }
 0x366   :  { %1502 = vmatpush3.bf16.msra.mxu0 %v1032_v49  ;;  %1699 = vmatpush3.bf16.msra.mxu1 %v1032_v49 }
 0x367   :  { %1503 = vmatprep.subr.bf16.mxu0 %v1041_v32  ;;  %1692 = vmatprep.subr.bf16.mxu1 %v1041_v32 }
 0x36a   :  { %1504 = vmatpush3.bf16.msra.mxu0 %v1033_v47  ;;  %1700 = vmatpush3.bf16.msra.mxu1 %v1033_v47 }
 0x36d   :  { %1082 = vmatmul.mubr.bf16.vlgmr.msra.gmra.mrb[64].mxu0 %v1960_v5  ;;  %1162 = vmatmul.mubr.bf16.vlgmr.msra.gmra.mrb[64].mxu1 %v2020_v27 }
 0x36e   :  { %1089 = vmatprep.mubr.bf16.mxu0 %v1965_v7  ;;  %1169 = vmatprep.mubr.bf16.mxu1 %v2022_v28 }
 0x375   :  { %1090 = vmatmul.mubr.bf16.gmra.mrb[68].mxu0 %v1969_v8  ;;  %1170 = vmatmul.mubr.bf16.gmra.mrb[68].mxu1 %v2029_v30  ;;  %v2139_v8 = vld [vmem:[%s2193_s5] ss:$0 sm:$0xff]  ;;  %s1830_s5 = smov [#allocation5]  }
 0x376   :  { %1097 = vmatprep.mubr.bf16.mxu0 %v1971_v9  ;;  %1177 = vmatprep.mubr.bf16.mxu1 %v2031_v31  ;;  %s1247_s16 = sshll.u32 %s1830_s5, 4  ;;  %s1248_s16 = int_to_ptr.vmem [resolvable:$true] %s1247_s16 }
 0x377   :  { %s1801_s2 = scalar_lea.vmem %s1248_s16, 4096  ;;  %p1806_p9 = scmp.lt.s32.totalorder %s1248_s16, %s1248_s16 }
 0x378   :  { %p1802_p8 = scmp.ne.s32.totalorder %s1248_s16, %s1801_s2  ;;  %p1807_p10 = scmp.lt.s32.totalorder %s1801_s2, %s1801_s2 }
 0x37a   :  { %p1808_p11 = por %p1807_p10, %p1806_p9 }
 0x37c   :  { %p1809_p12 = pnand %p1808_p11, %p1802_p8 }
 0x37d   :  { %1098 = vmatmul.mubr.bf16.gmra.mrb[72].mxu0 %v1975_v10  ;;  %1178 = vmatmul.mubr.bf16.gmra.mrb[72].mxu1 %v2041_v34 }
 0x37e   :  { %1105 = vmatprep.mubr.bf16.mxu0 %v1977_v11  ;;  %1185 = vmatprep.mubr.bf16.mxu1 %v2043_v35 }
 0x385   :  { %1106 = vmatmul.mubr.bf16.gmra.mrb[76].mxu0 %v1981_v12  ;;  %1186 = vmatmul.mubr.bf16.gmra.mrb[76].mxu1 %v2053_v38 }
 0x386   :  { %1113 = vmatprep.mubr.bf16.mxu0 %v1983_v13  ;;  %1193 = vmatprep.mubr.bf16.mxu1 %v2055_v39 }
 0x38d   :  { %1114 = vmatmul.mubr.bf16.gmra.mrb[80].mxu0 %v1987_v14  ;;  %1194 = vmatmul.mubr.bf16.gmra.mrb[80].mxu1 %v2059_v40 }
 0x38e   :  { %1121 = vmatprep.mubr.bf16.mxu0 %v1989_v15  ;;  %1201 = vmatprep.mubr.bf16.mxu1 %v2061_v41 }
 0x395   :  { %1122 = vmatmul.mubr.bf16.gmra.mrb[84].mxu0 %v1993_v16  ;;  %1202 = vmatmul.mubr.bf16.gmra.mrb[84].mxu1 %v2065_v42 }
 0x396   :  { %1129 = vmatprep.mubr.bf16.mxu0 %v1995_v17 }
 0x39d   :  { %1130 = vmatmul.mubr.bf16.gmra.mrb[88].mxu0 %v1999_v19 }
 0x39e   :  { %1137 = vmatprep.mubr.bf16.mxu0 %v2001_v20 }
 0x3a5   :  { %1138 = vmatmul.mubr.bf16.gmra.mrb[92].mxu0 %v2005_v21 }
 0x3a6   :  { %1145 = vmatprep.mubr.bf16.mxu0 %v2007_v22 }
 0x3ad   :  { %1146 = vmatmul.mubr.bf16.gmra.mrb[96].mxu0 %v2011_v23 }
 0x3ae   :  { %1153 = vmatprep.mubr.bf16.mxu0 %v2013_v24 }
 0x3b5   :  { %1154 = vmatmul.mubr.bf16.gmra.mrb[100].mxu0 %v2017_v25 }
 0x440   :  { %v1505_v5 = vpop.f32.mrb[64].mxu0  ;;  %v1565_v7 = vpop.f32.mrb[64].mxu1 }
 0x441   :  { %v1506_v9 = vpop.f32.mrb[65].mxu0  ;;  %v1566_v10 = vpop.f32.mrb[65].mxu1 }
 0x442   :  { %v1507_v11 = vadd.f32 %v1506_v9, %v1505_v5  ;;  %v1508_v12 = vpop.f32.mrb[66].mxu0  ;;  %v1567_v13 = vadd.f32 %v1566_v10, %v1565_v7  ;;  %v1568_v14 = vpop.f32.mrb[66].mxu1 }
 0x443   :  { %v1509_v15 = vpop.f32.mrb[67].mxu0  ;;  %v1569_v16 = vpop.f32.mrb[67].mxu1 }
 0x444   :  { %v1084_v17 = vadd.f32 %v1507_v11, %v2139_v8  ;;  %v1510_v19 = vadd.f32 %v1509_v15, %v1508_v12  ;;  %v1164_v20 = vadd.f32 %v1567_v13, %v2139_v8  ;;  %v1570_v21 = vadd.f32 %v1569_v16, %v1568_v14 }
 0x446   :  { %1210 = vst [vmem:[#allocation5] sm:$0xff] %v1084_v17  ;;  %v1087_v22 = vadd.f32 %v1510_v19, %v2139_v8  ;;  %1230 = vst [vmem:[#allocation5 + $0xa0] sm:$0xff] %v1164_v20  ;;  %v1167_v23 = vadd.f32 %v1570_v21, %v2139_v8 }
 0x448   :  { %1211 = vst [vmem:[#allocation5 + $0x8] sm:$0xff] %v1087_v22  ;;  %v1511_v24 = vpop.f32.mrb[68].mxu0  ;;  %1231 = vst [vmem:[#allocation5 + $0xa8] sm:$0xff] %v1167_v23  ;;  %v1571_v25 = vpop.f32.mrb[68].mxu1 }
 0x449   :  { %v1512_v27 = vpop.f32.mrb[69].mxu0  ;;  %v1572_v28 = vpop.f32.mrb[69].mxu1 }
 0x44a   :  { %v1513_v30 = vadd.f32 %v1512_v27, %v1511_v24  ;;  %v1514_v31 = vpop.f32.mrb[70].mxu0  ;;  %v1573_v34 = vadd.f32 %v1572_v28, %v1571_v25  ;;  %v1574_v35 = vpop.f32.mrb[70].mxu1 }
 0x44b   :  { %v1515_v38 = vpop.f32.mrb[71].mxu0  ;;  %v1575_v39 = vpop.f32.mrb[71].mxu1 }
 0x44c   :  { %v1092_v40 = vadd.f32 %v1513_v30, %v2139_v8  ;;  %v1516_v41 = vadd.f32 %v1515_v38, %v1514_v31  ;;  %v1172_v42 = vadd.f32 %v1573_v34, %v2139_v8  ;;  %v1576_v33 = vadd.f32 %v1575_v39, %v1574_v35 }
 0x44e   :  { %1212 = vst [vmem:[#allocation5 + $0x10] sm:$0xff] %v1092_v40  ;;  %v1095_v36 = vadd.f32 %v1516_v41, %v2139_v8  ;;  %1232 = vst [vmem:[#allocation5 + $0xb0] sm:$0xff] %v1172_v42  ;;  %v1175_v37 = vadd.f32 %v1576_v33, %v2139_v8 }
 0x450   :  { %1213 = vst [vmem:[#allocation5 + $0x18] sm:$0xff] %v1095_v36  ;;  %v1517_v43 = vpop.f32.mrb[72].mxu0  ;;  %1233 = vst [vmem:[#allocation5 + $0xb8] sm:$0xff] %v1175_v37  ;;  %v1577_v45 = vpop.f32.mrb[72].mxu1 }
 0x451   :  { %v1518_v18 = vpop.f32.mrb[73].mxu0  ;;  %v1578_v46 = vpop.f32.mrb[73].mxu1 }
 0x452   :  { %v1519_v47 = vadd.f32 %v1518_v18, %v1517_v43  ;;  %v1520_v48 = vpop.f32.mrb[74].mxu0  ;;  %v1579_v49 = vadd.f32 %v1578_v46, %v1577_v45  ;;  %v1580_v50 = vpop.f32.mrb[74].mxu1 }
 0x453   :  { %v1521_v51 = vpop.f32.mrb[75].mxu0  ;;  %v1581_v52 = vpop.f32.mrb[75].mxu1 }
 0x454   :  { %v1100_v53 = vadd.f32 %v1519_v47, %v2139_v8  ;;  %v1522_v54 = vadd.f32 %v1521_v51, %v1520_v48  ;;  %v1180_v55 = vadd.f32 %v1579_v49, %v2139_v8  ;;  %v1582_v56 = vadd.f32 %v1581_v52, %v1580_v50 }
 0x456   :  { %1214 = vst [vmem:[#allocation5 + $0x20] sm:$0xff] %v1100_v53  ;;  %v1103_v57 = vadd.f32 %v1522_v54, %v2139_v8  ;;  %1234 = vst [vmem:[#allocation5 + $0xc0] sm:$0xff] %v1180_v55  ;;  %v1183_v58 = vadd.f32 %v1582_v56, %v2139_v8 }
 0x458   :  { %1215 = vst [vmem:[#allocation5 + $0x28] sm:$0xff] %v1103_v57  ;;  %v1523_v59 = vpop.f32.mrb[76].mxu0  ;;  %1235 = vst [vmem:[#allocation5 + $0xc8] sm:$0xff] %v1183_v58  ;;  %v1583_v60 = vpop.f32.mrb[76].mxu1 }
 0x459   :  { %v1524_v61 = vpop.f32.mrb[77].mxu0  ;;  %v1584_v62 = vpop.f32.mrb[77].mxu1 }
 0x45a   :  { %v1525_v0 = vadd.f32 %v1524_v61, %v1523_v59  ;;  %v1526_v1 = vpop.f32.mrb[78].mxu0  ;;  %v1585_v2 = vadd.f32 %v1584_v62, %v1583_v60  ;;  %v1586_v3 = vpop.f32.mrb[78].mxu1 }
 0x45b   :  { %v1527_v63 = vpop.f32.mrb[79].mxu0  ;;  %v1587_v4 = vpop.f32.mrb[79].mxu1 }
 0x45c   :  { %v1108_v26 = vadd.f32 %v1525_v0, %v2139_v8  ;;  %v1528_v29 = vadd.f32 %v1527_v63, %v1526_v1  ;;  %v1188_v32 = vadd.f32 %v1585_v2, %v2139_v8  ;;  %v1588_v44 = vadd.f32 %v1587_v4, %v1586_v3 }
 0x45e   :  { %1216 = vst [vmem:[#allocation5 + $0x30] sm:$0xff] %v1108_v26  ;;  %v1111_v6 = vadd.f32 %v1528_v29, %v2139_v8  ;;  %1236 = vst [vmem:[#allocation5 + $0xd0] sm:$0xff] %v1188_v32  ;;  %v1191_v5 = vadd.f32 %v1588_v44, %v2139_v8 }
 0x460   :  { %1217 = vst [vmem:[#allocation5 + $0x38] sm:$0xff] %v1111_v6  ;;  %v1529_v7 = vpop.f32.mrb[80].mxu0  ;;  %1237 = vst [vmem:[#allocation5 + $0xd8] sm:$0xff] %v1191_v5  ;;  %v1589_v9 = vpop.f32.mrb[80].mxu1 }
 0x461   :  { %v1530_v10 = vpop.f32.mrb[81].mxu0  ;;  %v1590_v11 = vpop.f32.mrb[81].mxu1 }
 0x462   :  { %v1531_v12 = vadd.f32 %v1530_v10, %v1529_v7  ;;  %v1532_v13 = vpop.f32.mrb[82].mxu0  ;;  %v1591_v14 = vadd.f32 %v1590_v11, %v1589_v9  ;;  %v1592_v15 = vpop.f32.mrb[82].mxu1 }
 0x463   :  { %v1533_v16 = vpop.f32.mrb[83].mxu0  ;;  %v1593_v17 = vpop.f32.mrb[83].mxu1 }
 0x464   :  { %v1116_v19 = vadd.f32 %v1531_v12, %v2139_v8  ;;  %v1534_v20 = vadd.f32 %v1533_v16, %v1532_v13  ;;  %v1196_v21 = vadd.f32 %v1591_v14, %v2139_v8  ;;  %v1594_v22 = vadd.f32 %v1593_v17, %v1592_v15 }
 0x466   :  { %1218 = vst [vmem:[#allocation5 + $0x40] sm:$0xff] %v1116_v19  ;;  %v1119_v23 = vadd.f32 %v1534_v20, %v2139_v8  ;;  %1238 = vst [vmem:[#allocation5 + $0xe0] sm:$0xff] %v1196_v21  ;;  %v1199_v24 = vadd.f32 %v1594_v22, %v2139_v8 }
 0x468   :  { %1219 = vst [vmem:[#allocation5 + $0x48] sm:$0xff] %v1119_v23  ;;  %v1535_v25 = vpop.f32.mrb[84].mxu0  ;;  %1239 = vst [vmem:[#allocation5 + $0xe8] sm:$0xff] %v1199_v24  ;;  %v1595_v27 = vpop.f32.mrb[84].mxu1 }
 0x469   :  { %v1536_v28 = vpop.f32.mrb[85].mxu0  ;;  %v1596_v30 = vpop.f32.mrb[85].mxu1 }
 0x46a   :  { %v1537_v31 = vadd.f32 %v1536_v28, %v1535_v25  ;;  %v1538_v34 = vpop.f32.mrb[86].mxu0  ;;  %v1597_v35 = vadd.f32 %v1596_v30, %v1595_v27  ;;  %v1598_v38 = vpop.f32.mrb[86].mxu1 }
 0x46b   :  { %v1539_v39 = vpop.f32.mrb[87].mxu0  ;;  %v1599_v40 = vpop.f32.mrb[87].mxu1 }
 0x46c   :  { %v1124_v41 = vadd.f32 %v1537_v31, %v2139_v8  ;;  %v1540_v42 = vadd.f32 %v1539_v39, %v1538_v34  ;;  %v1204_v33 = vadd.f32 %v1597_v35, %v2139_v8  ;;  %v1600_v36 = vadd.f32 %v1599_v40, %v1598_v38 }
 0x46e   :  { %1220 = vst [vmem:[#allocation5 + $0x50] sm:$0xff] %v1124_v41  ;;  %v1127_v37 = vadd.f32 %v1540_v42, %v2139_v8  ;;  %1240 = vst [vmem:[#allocation5 + $0xf0] sm:$0xff] %v1204_v33  ;;  %v1207_v43 = vadd.f32 %v1600_v36, %v2139_v8 }
 0x470   :  { %1221 = vst [vmem:[#allocation5 + $0x58] sm:$0xff] %v1127_v37  ;;  %v1541_v45 = vpop.f32.mrb[88].mxu0  ;;  %1241 = vst [vmem:[#allocation5 + $0xf8] sm:$0xff] %v1207_v43 }
 0x471   :  { %v1542_v18 = vpop.f32.mrb[89].mxu0 }
 0x472   :  { %v1543_v46 = vadd.f32 %v1542_v18, %v1541_v45  ;;  %v1544_v47 = vpop.f32.mrb[90].mxu0 }
 0x473   :  { %v1545_v48 = vpop.f32.mrb[91].mxu0 }
 0x474   :  { %v1132_v49 = vadd.f32 %v1543_v46, %v2139_v8  ;;  %v1546_v50 = vadd.f32 %v1545_v48, %v1544_v47 }
 0x476   :  { %1222 = vst [vmem:[#allocation5 + $0x60] sm:$0xff] %v1132_v49  ;;  %v1135_v51 = vadd.f32 %v1546_v50, %v2139_v8 }
 0x478   :  { %1223 = vst [vmem:[#allocation5 + $0x68] sm:$0xff] %v1135_v51  ;;  %v1547_v52 = vpop.f32.mrb[92].mxu0 }
 0x479   :  { %v1548_v53 = vpop.f32.mrb[93].mxu0 }
 0x47a   :  { %v1549_v54 = vadd.f32 %v1548_v53, %v1547_v52  ;;  %v1550_v55 = vpop.f32.mrb[94].mxu0 }
 0x47b   :  { %v1551_v56 = vpop.f32.mrb[95].mxu0 }
 0x47c   :  { %v1140_v57 = vadd.f32 %v1549_v54, %v2139_v8  ;;  %v1552_v58 = vadd.f32 %v1551_v56, %v1550_v55 }
 0x47e   :  { %1224 = vst [vmem:[#allocation5 + $0x70] sm:$0xff] %v1140_v57  ;;  %v1143_v59 = vadd.f32 %v1552_v58, %v2139_v8 }
 0x480   :  { %1225 = vst [vmem:[#allocation5 + $0x78] sm:$0xff] %v1143_v59  ;;  %v1553_v60 = vpop.f32.mrb[96].mxu0 }
 0x481   :  { %v1554_v61 = vpop.f32.mrb[97].mxu0 }
 0x482   :  { %v1555_v62 = vadd.f32 %v1554_v61, %v1553_v60  ;;  %v1556_v0 = vpop.f32.mrb[98].mxu0 }
 0x483   :  { %v1557_v1 = vpop.f32.mrb[99].mxu0 }
 0x484   :  { %v1148_v2 = vadd.f32 %v1555_v62, %v2139_v8  ;;  %v1558_v3 = vadd.f32 %v1557_v1, %v1556_v0 }
 0x486   :  { %1226 = vst [vmem:[#allocation5 + $0x80] sm:$0xff] %v1148_v2  ;;  %v1151_v63 = vadd.f32 %v1558_v3, %v2139_v8 }
 0x488   :  { %1227 = vst [vmem:[#allocation5 + $0x88] sm:$0xff] %v1151_v63  ;;  %v1559_v4 = vpop.f32.mrb[100].mxu0 }
 0x489   :  { %v1560_v26 = vpop.f32.mrb[101].mxu0 }
 0x48a   :  { %v1561_v29 = vadd.f32 %v1560_v26, %v1559_v4  ;;  %v1562_v32 = vpop.f32.mrb[102].mxu0 }
 0x48b   :  { %v1563_v44 = vpop.f32.mrb[103].mxu0 }
 0x48c   :  { %v1156_v6 = vadd.f32 %v1561_v29, %v2139_v8  ;;  %v1564_v5 = vadd.f32 %v1563_v44, %v1562_v32 }
 0x48e   :  { %1228 = vst [vmem:[#allocation5 + $0x90] sm:$0xff] %v1156_v6  ;;  %v1159_v7 = vadd.f32 %v1564_v5, %v2139_v8 }
 0x490   :  { %1229 = vst [vmem:[#allocation5 + $0x98] sm:$0xff] %v1159_v7 }
 0x491   :  { %1812 = shalt.err (!%p1809_p12)
}
 0x492   :  { %s1813_s19 = scalar_lea.hbm %s2194_s6, 4096 }
 0x493   :  { %p1814_p13 = scmp.ne.s32.totalorder %s2194_s6, %s1813_s19  ;;  %p1817_p0 = scmp.lt.u32.totalorder %s1813_s19, %s2194_s6 }
 0x495   :  { %p1819_p1 = pnand %p1817_p0, %p1814_p13 }
 0x497   :  { %1822 = shalt.err (!%p1819_p1)
}
 0x498   :  { %1253 = dma.vmem_to_hbm [thread:$0]  %s1248_s16, 4096, %s2194_s6, [#allocation4], %s1828_s7, %s1828_s7, %s1829_s8  }
 0x499   :  { %1825 = dma.done.wait [#allocation4], 4096  }
 0x49a   :  { %1826 = vsyncadd [#allocation4], 4294963200 }
 0x49b   :  { %1257 = vsyncpa [#allocation3], 1 }
 0x49c   :  { %1258 = vsyncpa [#allocation4], 1 }

</bundles_post_ra>
